<compile_context>
chip_gen: v7x
topology: tpu7x:2x2x1
jax: 0.10.0
libtpu: 0.0.40
codegen_flags: <defaults>
</compile_context>

<pallas_src>
import jax
import jax.numpy as jnp
from jax.experimental import pallas as pl
from jax.experimental.pallas import tpu as pltpu

EPS = 1e-5
LANE = 128                      # channel dim padded to a multiple of this

# Per-generation VMEM budget (v7x: 64 MiB physical -> ~48 MiB scoped;
# v5e/v6e: 128 MiB -> ~96 MiB scoped).
try:
    _VMEM_CAP = int(pltpu.get_tpu_info().vmem_capacity_bytes)
except Exception:  # query unavailable -> conservative default
    _VMEM_CAP = 64 * 1024 * 1024
VMEM_LIMIT = min((_VMEM_CAP * 3) // 4, 96 * 1024 * 1024)
TM_MAX = 1024 if _VMEM_CAP >= 128 * 1024 * 1024 else 512
TK_MAX = 4736                   # full-K residency for every ResNet-18 layer


def _cdiv(a, b):
    return (a + b - 1) // b


def _round_up(x, m):
    return _cdiv(x, m) * m


def _pad2d(a, rows=None, cols=None):
    r = 0 if rows is None else rows - a.shape[0]
    c = 0 if cols is None else cols - a.shape[1]
    if r == 0 and c == 0:
        return a
    return jnp.pad(a, ((0, r), (0, c)))


# ----------------------------------------------------------------------------
# Pallas kernels
# ----------------------------------------------------------------------------
def _sublane_partials(y):
    """Per-sublane partial channel sums / sums-of-squares of a (tm, C) tile.
    (tm is a multiple of 8, so this is a pure-metadata reshape + vreg adds.)"""
    c = y.shape[-1]
    y3 = y.reshape(-1, 8, c)
    return jnp.sum(y3, axis=0), jnp.sum(y3 * y3, axis=0)


def _mm_stats_kernel(a_ref, b_ref, y_ref, ps_ref, pq_ref):
    """y = a @ b, full K resident (weights fetched once). Stats are computed
    from the f32 accumulator, then y is stored as bf16 (half the HBM write)."""
    y = jnp.dot(a_ref[...], b_ref[...], preferred_element_type=jnp.float32)
    y_ref[...] = y.astype(y_ref.dtype)
    ps, pq = _sublane_partials(y)
    ps_ref[...] = ps
    pq_ref[...] = pq


def _mm_stats_ktiled_kernel(a_ref, b_ref, y_ref, ps_ref, pq_ref, acc_ref):
    """Fallback for very large K: K tiled on an 'arbitrary' axis with an f32
    VMEM accumulator; stats + bf16 store only on the last K step."""
    k = pl.program_id(1)

    @pl.when(k == 0)
    def _():
        acc_ref[...] = jnp.zeros_like(acc_ref)

    acc_ref[...] += jnp.dot(a_ref[...], b_ref[...],
                            preferred_element_type=jnp.float32)

    @pl.when(k == pl.num_programs(1) - 1)
    def _():
        y = acc_ref[...]
        y_ref[...] = y.astype(y_ref.dtype)
        ps, pq = _sublane_partials(y)
        ps_ref[...] = ps
        pq_ref[...] = pq


def _mm_stats_only_kernel(a_ref, b_ref, ps_ref, pq_ref):
    """Channel stats of (a @ b) without writing the product to HBM.  Used to
    fold the shortcut BN; the fused tail kernel recomputes the cheap 1x1 dot."""
    y = jnp.dot(a_ref[...], b_ref[...], preferred_element_type=jnp.float32)
    ps, pq = _sublane_partials(y)
    ps_ref[...] = ps
    pq_ref[...] = pq


def _bn_relu_kernel(y_ref, s_ref, b_ref, o_ref):
    o_ref[...] = jnp.maximum(y_ref[...] * s_ref[...] + b_ref[...],
                             0.0).astype(o_ref.dtype)


def _tail_proj_kernel(y2_ref, s2_ref, b2_ref, xs_ref, ws_ref, ss_ref, bs_ref,
                      o_ref):
    """relu(bn2(conv2) + bn_s(conv1x1(x))) with the shortcut 1x1 conv fused."""
    ys = jnp.dot(xs_ref[...], ws_ref[...], preferred_element_type=jnp.float32)
    o_ref[...] = jnp.maximum(
        y2_ref[...] * s2_ref[...] + b2_ref[...]
        + ys * ss_ref[...] + bs_ref[...], 0.0).astype(o_ref.dtype)


def _tail_identity_kernel(y2_ref, s2_ref, b2_ref, r_ref, o_ref):
    o_ref[...] = jnp.maximum(
        y2_ref[...] * s2_ref[...] + b2_ref[...] + r_ref[...],
        0.0).astype(o_ref.dtype)


# ----------------------------------------------------------------------------
# pallas_call wrappers
# ----------------------------------------------------------------------------
def pallas_matmul_stats(a, b, tm, m_true):
    """a: [M_pad, K] bf16, b: [K, C] bf16 -> (y [M_pad, C] bf16, mean, var).
    Padded rows of `a` are exactly zero, so dividing the stats by m_true is
    exact (padded rows contribute nothing to the dot)."""
    m, k = a.shape
    c = b.shape[1]
    nb = m // tm

    if k <= TK_MAX:
        # Full-K path: B's block index is constant -> weights fetched once.
        y, ps, pq = pl.pallas_call(
            _mm_stats_kernel,
            out_shape=(jax.ShapeDtypeStruct((m, c), jnp.bfloat16),
                       jax.ShapeDtypeStruct((nb * 8, c), jnp.float32),
                       jax.ShapeDtypeStruct((nb * 8, c), jnp.float32)),
            grid=(nb,),
            in_specs=[pl.BlockSpec((tm, k), lambda i: (i, 0)),
                      pl.BlockSpec((k, c), lambda i: (0, 0))],
            out_specs=(pl.BlockSpec((tm, c), lambda i: (i, 0)),
                       pl.BlockSpec((8, c), lambda i: (i, 0)),
                       pl.BlockSpec((8, c), lambda i: (i, 0))),
            compiler_params=pltpu.CompilerParams(
                dimension_semantics=("parallel",),
                vmem_limit_bytes=VMEM_LIMIT),
        )(a, b)
    else:
        # K-tiled fallback (no 2x zero-padding: tk sized from cdiv(k, kb)).
        kb = _cdiv(k, TK_MAX)
        tk = _round_up(_cdiv(k, kb), 128)
        k_pad = kb * tk
        a = _pad2d(a, cols=k_pad)
        b = _pad2d(b, rows=k_pad)
        y, ps, pq = pl.pallas_call(
            _mm_stats_ktiled_kernel,
            out_shape=(jax.ShapeDtypeStruct((m, c), jnp.bfloat16),
                       jax.ShapeDtypeStruct((nb * 8, c), jnp.float32),
                       jax.ShapeDtypeStruct((nb * 8, c), jnp.float32)),
            grid=(nb, kb),
            in_specs=[pl.BlockSpec((tm, tk), lambda i, j: (i, j)),
                      pl.BlockSpec((tk, c), lambda i, j: (j, 0))],
            out_specs=(pl.BlockSpec((tm, c), lambda i, j: (i, 0)),
                       pl.BlockSpec((8, c), lambda i, j: (i, 0)),
                       pl.BlockSpec((8, c), lambda i, j: (i, 0))),
            scratch_shapes=[pltpu.VMEM((tm, c), jnp.float32)],
            compiler_params=pltpu.CompilerParams(
                dimension_semantics=("parallel", "arbitrary"),
                vmem_limit_bytes=VMEM_LIMIT),
        )(a, b)

    # NOTE: E[y^2] - mean^2 in f32; fine at the 2e-2 test tolerance.
    mean = jnp.sum(ps, axis=0, keepdims=True) / m_true
    var = jnp.sum(pq, axis=0, keepdims=True) / m_true - mean * mean
    return y, mean, var


def pallas_conv_stats_only(a, b, tm, m_true):
    m, k = a.shape
    c = b.shape[1]
    nb = m // tm
    ps, pq = pl.pallas_call(
        _mm_stats_only_kernel,
        out_shape=(jax.ShapeDtypeStruct((nb * 8, c), jnp.float32),
                   jax.ShapeDtypeStruct((nb * 8, c), jnp.float32)),
        grid=(nb,),
        in_specs=[pl.BlockSpec((tm, k), lambda i: (i, 0)),
                  pl.BlockSpec((k, c), lambda i: (0, 0))],
        out_specs=(pl.BlockSpec((8, c), lambda i: (i, 0)),
                   pl.BlockSpec((8, c), lambda i: (i, 0))),
        compiler_params=pltpu.CompilerParams(
            dimension_semantics=("parallel",),
            vmem_limit_bytes=VMEM_LIMIT),
    )(a, b)
    mean = jnp.sum(ps, axis=0, keepdims=True) / m_true
    var = jnp.sum(pq, axis=0, keepdims=True) / m_true - mean * mean
    return mean, var


def pallas_bn_relu(y, scale, bias, tm, out_dtype=jnp.bfloat16):
    m, c = y.shape
    return pl.pallas_call(
        _bn_relu_kernel,
        out_shape=jax.ShapeDtypeStruct((m, c), out_dtype),
        grid=(m // tm,),
        in_specs=[pl.BlockSpec((tm, c), lambda i: (i, 0)),
                  pl.BlockSpec((1, c), lambda i: (0, 0)),
                  pl.BlockSpec((1, c), lambda i: (0, 0))],
        out_specs=pl.BlockSpec((tm, c), lambda i: (i, 0)),
        compiler_params=pltpu.CompilerParams(
            dimension_semantics=("parallel",),
            vmem_limit_bytes=VMEM_LIMIT),
    )(y, scale, bias)


def pallas_tail_proj(y2, s2, b2, xs, ws, ss, bs, tm):
    m, c = y2.shape
    k = xs.shape[1]
    return pl.pallas_call(
        _tail_proj_kernel,
        out_shape=jax.ShapeDtypeStruct((m, c), jnp.float32),
        grid=(m // tm,),
        in_specs=[pl.BlockSpec((tm, c), lambda i: (i, 0)),
                  pl.BlockSpec((1, c), lambda i: (0, 0)),
                  pl.BlockSpec((1, c), lambda i: (0, 0)),
                  pl.BlockSpec((tm, k), lambda i: (i, 0)),
                  pl.BlockSpec((k, c), lambda i: (0, 0)),
                  pl.BlockSpec((1, c), lambda i: (0, 0)),
                  pl.BlockSpec((1, c), lambda i: (0, 0))],
        out_specs=pl.BlockSpec((tm, c), lambda i: (i, 0)),
        compiler_params=pltpu.CompilerParams(
            dimension_semantics=("parallel",),
            vmem_limit_bytes=VMEM_LIMIT),
    )(y2, s2, b2, xs, ws, ss, bs)


def pallas_tail_identity(y2, s2, b2, resid, tm):
    m, c = y2.shape
    return pl.pallas_call(
        _tail_identity_kernel,
        out_shape=jax.ShapeDtypeStruct((m, c), jnp.float32),
        grid=(m // tm,),
        in_specs=[pl.BlockSpec((tm, c), lambda i: (i, 0)),
                  pl.BlockSpec((1, c), lambda i: (0, 0)),
                  pl.BlockSpec((1, c), lambda i: (0, 0)),
                  pl.BlockSpec((tm, c), lambda i: (i, 0))],
        out_specs=pl.BlockSpec((tm, c), lambda i: (i, 0)),
        compiler_params=pltpu.CompilerParams(
            dimension_semantics=("parallel",),
            vmem_limit_bytes=VMEM_LIMIT),
    )(y2, s2, b2, resid)


# ----------------------------------------------------------------------------
# Glue: im2col, weight reshaping, BN folding, full BasicBlock forward
# ----------------------------------------------------------------------------
def im2col(x_nhwc, ksize, stride, pad):
    n, h, w, c = x_nhwc.shape
    ho = (h + 2 * pad - ksize) // stride + 1
    wo = (w + 2 * pad - ksize) // stride + 1
    xp = jnp.pad(x_nhwc, ((0, 0), (pad, pad), (pad, pad), (0, 0)))
    cols = []
    for kh in range(ksize):
        for kw in range(ksize):
            cols.append(xp[:, kh:kh + ho * stride:stride,
                           kw:kw + wo * stride:stride, :])
    patches = jnp.concatenate(cols, axis=-1)          # [n, ho, wo, k*k*c]
    return patches.reshape(n * ho * wo, ksize * ksize * c), (ho, wo)


def _w_to_mat(w):
    """PyTorch OIHW conv weight -> [kh*kw*Cin, Cout] matching im2col order."""
    co, ci, kh, kw = w.shape
    return jnp.transpose(w, (2, 3, 1, 0)).reshape(kh * kw * ci, co)


def _fold_bn(mean, var, gamma, beta):
    scale = gamma * jax.lax.rsqrt(var + EPS)
    return scale, beta - mean * scale


def _pick_tm(m_true):
    """>= 2 blocks on the 'parallel' M axis so both v7x TCs get work."""
    return max(8, min(TM_MAX, _round_up(_cdiv(m_true, 2), 8)))


def basic_block_forward(x_nchw, params, stride):
    n, cin, h, w = x_nchw.shape
    cout = params["w1"].shape[0]
    c = _round_up(cout, LANE)                          # lane-dense channel dim
    x_nhwc = jnp.transpose(x_nchw, (0, 2, 3, 1)).astype(jnp.float32)

    # ---- conv1 (3x3, stride, pad 1) with fused BN stats, then bn1+relu -----
    p1, (ho, wo) = im2col(x_nhwc, 3, stride, 1)
    m_true = n * ho * wo
    tm = _pick_tm(m_true)
    m_pad = _round_up(m_true, tm)

    k1 = _round_up(p1.shape[1], 128)                   # lane-dense K
    p1 = _pad2d(p1, rows=m_pad, cols=k1).astype(jnp.bfloat16)
    w1 = _pad2d(_w_to_mat(params["w1"]), rows=k1, cols=c).astype(jnp.bfloat16)
    g1 = _pad2d(params["g1"], cols=c)
    be1 = _pad2d(params["b1"], cols=c)
    y1, mu1, var1 = pallas_matmul_stats(p1, w1, tm, m_true)   # y1: bf16
    s1, b1f = _fold_bn(mu1, var1, g1, be1)
    o1 = pallas_bn_relu(y1, s1, b1f, tm)               # bf16, [m_pad, c]

    # ---- conv2 (3x3, stride 1, pad 1) with fused BN stats ------------------
    # TODO(synk): gather these patches in-kernel (implicit GEMM) and fold
    # bn1+relu into the A-operand load to drop the o1/p2 HBM intermediates.
    o1_nhwc = o1[:m_true, :cout].reshape(n, ho, wo, cout)
    p2, _ = im2col(o1_nhwc, 3, 1, 1)
    k2 = _round_up(p2.shape[1], 128)
    p2 = _pad2d(p2, rows=m_pad, cols=k2).astype(jnp.bfloat16)
    w2 = _pad2d(_w_to_mat(params["w2"]), rows=k2, cols=c).astype(jnp.bfloat16)
    g2 = _pad2d(params["g2"], cols=c)
    be2 = _pad2d(params["b2"], cols=c)
    y2, mu2, var2 = pallas_matmul_stats(p2, w2, tm, m_true)   # y2: bf16
    s2, b2f = _fold_bn(mu2, var2, g2, be2)

    # ---- shortcut + bn2 apply + residual add + relu (one fused tail) -------
    if stride != 1 or cin != cout:
        xs = x_nhwc[:, ::stride, ::stride, :].reshape(m_true, cin)
        ks = _round_up(cin, 128)
        xs = _pad2d(xs, rows=m_pad, cols=ks).astype(jnp.bfloat16)
        ws = _pad2d(_w_to_mat(params["ws"]), rows=ks, cols=c).astype(jnp.bfloat16)
        gs = _pad2d(params["gs"], cols=c)
        bes = _pad2d(params["bs"], cols=c)
        mus, vars_ = pallas_conv_stats_only(xs, ws, tm, m_true)
        ssf, bsf = _fold_bn(mus, vars_, gs, bes)
        out = pallas_tail_proj(y2, s2, b2f, xs, ws, ssf, bsf, tm)
    else:
        resid = _pad2d(x_nhwc.reshape(m_true, cin),
                       rows=m_pad, cols=c).astype(jnp.bfloat16)
        out = pallas_tail_identity(y2, s2, b2f, resid, tm)

    out = out[:m_true, :cout].reshape(n, ho, wo, cout)
    return jnp.transpose(out, (0, 3, 1, 2))


# ----------------------------------------------------------------------------
# Pure-JAX reference (correctness check only)
# ----------------------------------------------------------------------------
def ref_forward(x, params, stride):
    def conv(x, w, s, pad):
        return jax.lax.conv_general_dilated(
            x, w, (s, s), [(pad, pad), (pad, pad)],
            dimension_numbers=("NCHW", "OIHW", "NCHW"))

    def bn(x, g, b):
        mean = jnp.mean(x, axis=(0, 2, 3), keepdims=True)
        var = jnp.mean((x - mean) ** 2, axis=(0, 2, 3), keepdims=True)
        return (g.reshape(1, -1, 1, 1) * (x - mean) * jax.lax.rsqrt(var + EPS)
                + b.reshape(1, -1, 1, 1))

    cin, cout = x.shape[1], params["w1"].shape[0]
    o = jax.nn.relu(bn(conv(x, params["w1"], stride, 1),
                       params["g1"], params["b1"]))
    o = bn(conv(o, params["w2"], 1, 1), params["g2"], params["b2"])
    if stride != 1 or cin != cout:
        sc = bn(conv(x, params["ws"], stride, 0), params["gs"], params["bs"])
    else:
        sc = x
    return jax.nn.relu(o + sc)


# ----------------------------------------------------------------------------
# Main
# ----------------------------------------------------------------------------
def make_params(key, in_planes, planes, with_proj):
    ks = jax.random.split(key, 9)
    p = {
        "w1": 0.1 * jax.random.normal(ks[0], (planes, in_planes, 3, 3), jnp.float32),
        "g1": 1.0 + 0.1 * jax.random.normal(ks[1], (1, planes), jnp.float32),
        "b1": 0.1 * jax.random.normal(ks[2], (1, planes), jnp.float32),
        "w2": 0.1 * jax.random.normal(ks[3], (planes, planes, 3, 3), jnp.float32),
        "g2": 1.0 + 0.1 * jax.random.normal(ks[4], (1, planes), jnp.float32),
        "b2": 0.1 * jax.random.normal(ks[5], (1, planes), jnp.float32),
    }
    if with_proj:
        p["ws"] = 0.1 * jax.random.normal(ks[6], (planes, in_planes, 1, 1), jnp.float32)
        p["gs"] = 1.0 + 0.1 * jax.random.normal(ks[7], (1, planes), jnp.float32)
        p["bs"] = 0.1 * jax.random.normal(ks[8], (1, planes), jnp.float32)
    return p


if __name__ == "__main__":
    key = jax.random.PRNGKey(0)
    n, h, w = 2, 16, 16
    configs = [
        (4, 8, 1),   # projection shortcut (channel change)
        (8, 8, 1),   # identity shortcut
        (4, 8, 2),   # projection shortcut + spatial downsample
    ]
    for idx, (in_planes, planes, stride) in enumerate(configs):
        kx, kp = jax.random.split(jax.random.fold_in(key, idx))
        x = jax.random.normal(kx, (n, in_planes, h, w), jnp.float32)
        with_proj = (stride != 1) or (in_planes != planes)
        params = make_params(kp, in_planes, planes, with_proj)

        out = jax.block_until_ready(basic_block_forward(x, params, stride))
        ref = jax.block_until_ready(ref_forward(x, params, stride))

        assert out.shape == (n, planes, h // stride, w // stride)
        assert jnp.allclose(out, ref, atol=2e-2, rtol=2e-2), \
            f"mismatch vs reference for config {(in_planes, planes, stride)}"

    print("KERNEL_OK")
</pallas_src>

<mosaic_0001>
module attributes {stable_mosaic.version = 11 : i64} {
  func.func @_mm_stats_kernel(%arg0: i32, %arg1: memref<256x128xbf16, #tpu.memory_space<vmem>>, %arg2: memref<128x128xbf16, #tpu.memory_space<vmem>>, %arg3: memref<256x128xbf16, #tpu.memory_space<vmem>>, %arg4: memref<8x128xf32, #tpu.memory_space<vmem>>, %arg5: memref<8x128xf32, #tpu.memory_space<vmem>>) attributes {dimension_semantics = [#tpu.dimension_semantics<parallel>], iteration_bounds = array<i64: 2>, scalar_prefetch = 0 : i64, scratch_operands = 0 : i64, tpu.core_type = #tpu.core_type<tc>, window_params = [{transform_indices = @transform_0, window_bounds = array<i64: 256, 128>}, {pipeline_mode = #tpu.pipeline_mode<synchronous>, transform_indices = @transform_1, window_bounds = array<i64: 128, 128>}, {transform_indices = @transform_2, window_bounds = array<i64: 256, 128>}, {transform_indices = @transform_3, window_bounds = array<i64: 8, 128>}, {transform_indices = @transform_4, window_bounds = array<i64: 8, 128>}]} {
    %c0 = arith.constant 0 : index
    %c0_0 = arith.constant 0 : index
    %0 = vector.load %arg1[%c0, %c0_0] : memref<256x128xbf16, #tpu.memory_space<vmem>>, vector<256x128xbf16>
    %c0_1 = arith.constant 0 : index
    %c0_2 = arith.constant 0 : index
    %1 = vector.load %arg2[%c0_1, %c0_2] : memref<128x128xbf16, #tpu.memory_space<vmem>>, vector<128x128xbf16>
    %cst = arith.constant dense<0.000000e+00> : vector<256x128xf32>
    %2 = tpu.matmul %0, %1, %cst {dimension_numbers = #tpu.dot_dimension_numbers<[1], [0], [0], [1], [0, 0, 1, 1], [], []>} : vector<256x128xbf16>, vector<128x128xbf16>, vector<256x128xf32> -> vector<256x128xf32>
    %3 = arith.truncf %2 : vector<256x128xf32> to vector<256x128xbf16>
    %c0_3 = arith.constant 0 : index
    %c0_4 = arith.constant 0 : index
    %4 = vector.load %arg3[%c0_3, %c0_4] : memref<256x128xbf16, #tpu.memory_space<vmem>>, vector<256x128xbf16>
    tpu.vector_store %arg3[%c0_3, %c0_4], %3 {strides = array<i32>} : memref<256x128xbf16, #tpu.memory_space<vmem>>, vector<256x128xbf16>,
    %5 = vector.shape_cast %2 : vector<256x128xf32> to vector<32x8x128xf32>
    %cst_5 = arith.constant dense<0.000000e+00> : vector<8x128xf32>
    %6 = vector.multi_reduction <add>, %5, %cst_5 [0] : vector<32x8x128xf32> to vector<8x128xf32>
    %7 = arith.mulf %5, %5 : vector<32x8x128xf32>
    %cst_6 = arith.constant dense<0.000000e+00> : vector<8x128xf32>
    %8 = vector.multi_reduction <add>, %7, %cst_6 [0] : vector<32x8x128xf32> to vector<8x128xf32>
    %c0_7 = arith.constant 0 : index
    %c0_8 = arith.constant 0 : index
    %9 = vector.load %arg4[%c0_7, %c0_8] : memref<8x128xf32, #tpu.memory_space<vmem>>, vector<8x128xf32>
    tpu.vector_store %arg4[%c0_7, %c0_8], %6 {strides = array<i32>} : memref<8x128xf32, #tpu.memory_space<vmem>>, vector<8x128xf32>,
    %c0_9 = arith.constant 0 : index
    %c0_10 = arith.constant 0 : index
    %10 = vector.load %arg5[%c0_9, %c0_10] : memref<8x128xf32, #tpu.memory_space<vmem>>, vector<8x128xf32>
    tpu.vector_store %arg5[%c0_9, %c0_10], %8 {strides = array<i32>} : memref<8x128xf32, #tpu.memory_space<vmem>>, vector<8x128xf32>,
    return
  }
  func.func @transform_0(%arg0: i32) -> (i32, i32) {
    %c0_i32 = arith.constant 0 : i32
    %c0_i32_0 = arith.constant 0 : i32
    return %arg0, %c0_i32 : i32, i32
  }
  func.func @transform_1(%arg0: i32) -> (i32, i32) {
    %c0_i32 = arith.constant 0 : i32
    %c0_i32_0 = arith.constant 0 : i32
    %c0_i32_1 = arith.constant 0 : i32
    return %c0_i32, %c0_i32_0 : i32, i32
  }
  func.func @transform_2(%arg0: i32) -> (i32, i32) {
    %c0_i32 = arith.constant 0 : i32
    %c0_i32_0 = arith.constant 0 : i32
    return %arg0, %c0_i32 : i32, i32
  }
  func.func @transform_3(%arg0: i32) -> (i32, i32) {
    %c0_i32 = arith.constant 0 : i32
    %c0_i32_0 = arith.constant 0 : i32
    return %arg0, %c0_i32 : i32, i32
  }
  func.func @transform_4(%arg0: i32) -> (i32, i32) {
    %c0_i32 = arith.constant 0 : i32
    %c0_i32_0 = arith.constant 0 : i32
    return %arg0, %c0_i32 : i32, i32
  }
}

</mosaic_0001>

<bundles_post_ra>
// kernel: tpu_custom_call.1
= control target key start
LH: loop header
LB: loop body
LE: loop exit
PB: predicated region body
PF: predicated region fallthrough
CT: control target
= control target key end

     0   :  { %10 = vsyncpa [#allocation3], 0  ;;  %s2084_s0 = inlined_call_operand.hbm [shape: bf16[512,128], index: 0, kind: input, shape index: {}]   ;;  %s2085_s1 = inlined_call_operand.hbm [shape: bf16[128,128], index: 1, kind: input, shape index: {}]   ;;  %s2086_s2 = inlined_call_operand.hbm [shape: bf16[512,128], index: 2, kind: output, shape index: {0}]   ;;  %s2087_s3 = inlined_call_operand.hbm [shape: f32[16,128], index: 3, kind: output, shape index: {1}]   ;;  %s2088_s4 = inlined_call_operand.hbm [shape: f32[16,128], index: 4, kind: output, shape index: {2}]  }
   0x1   :  { %12 = vsyncpa [#allocation3 + $0x1], 0 }
   0x2   :  { %13 = vsyncpa [#allocation6], 0 }
   0x3   :  { %14 = vsyncpa [#allocation4], 0 }
   0x4   :  { %16 = vsyncpa [#allocation4 + $0x1], 0 }
   0x5   :  { %17 = vsyncpa [#allocation9], 0 }
   0x6   :  { %19 = vsyncpa [#allocation9 + $0x1], 0  ;;  %s1669_s15 = smov 0   ;;  %s1671_s16 = smov 0  }
   0x7   :  { %s1673_s17 = smov 0   ;;  %s1675_s18 = smov 0  }
   0x8 LB: > { %s1690_s19 = sadd.s32 4294967295, %s1633_s18   ;;  %s1055_s20 = sadd.s32 4294967294, %s1633_s18   ;;  %s1633_s18 = sphi %s1675_s18, %s2108_s18   ;;  %s1629_s17 = sphi %s1673_s17, %s2107_s17   ;;  %s1625_s16 = sphi %s1671_s16, %s2106_s16   ;;  %s1621_s15 = sphi %s1669_s15, %s2105_s15  }
   0x9   : > { %p45_p0 = scmp.ne.s32.totalorder %s1625_s16, %s1621_s15  ;;  %p2089_p1 = scmp.eq.s32.totalorder %s1690_s19, 0 }
   0xa   : > { %p96_p3 = scmp.eq.s32.totalorder %s1055_s20, 1  ;;  %p1056_p5 = scmp.ge.s32.totalorder %s1633_s18, 1 }
   0xb   : > { %p1701_p4 = por %p2089_p1, %p45_p0  ;;  %p155_p7 = scmp.lt.s32.totalorder %s1633_s18, 3 }
   0xc   : > { %p1706_p6 = por %p96_p3, %p45_p0  ;;  %s1635_s24 = smov [#allocation5]  }
   0xd   : > { %s2092_s21 = scalar_select %p1701_p4, 1, 0 }
   0xe   : > { %s2093_s22 = scalar_select %p1706_p6, 1, 0 }
   0xf   : > { %p1711_p8 = pnand %p1056_p5, %p155_p7  ;;  %s167_s25 = sshll.u32 %s1635_s24, 4  ;;  %s1715_s25 = int_to_ptr.vmem [resolvable:$true] %s167_s25 }
  0x10   : > { %s1727_s27 = sadd.s32 1, %s1633_s18   ;;  %s32_s28 = sadd.s32 1, %s1629_s17 }
  0x11   : > { %s2094_s23 = scalar_select %p1711_p8, 1, 0 }
  0x12   : > { %p1362_p9 = pneg %p1711_p8  ;;  %s29_s29 = ssub.s32 %s1633_s18, %s1727_s27 }
  0x13   : > { %s1445_s6 = scalar_lea.hbm %s2085_s1, 1024 }
  0x14   : > { %p1722_p11 = pnand %p1362_p9, %p2089_p1  ;;  %p1446_p12 = scmp.ne.s32.totalorder %s2085_s1, %s1445_s6 }
  0x15   : > { %p1452_p5 = scmp.lt.u32.totalorder %s1445_s6, %s2085_s1 }
  0x16   : > { %p1447_p13 = pneg %p1722_p11 }
  0x18   : > { %p1448_p0 = pnand %p1447_p13, %p1446_p12 }
  0x1a   : > { %p1449_p3 = pneg %p1448_p0 }
  0x1c   : > { %p1454_p7 = pnand %p1452_p5, %p1449_p3 }
  0x1e   : > { %1457 = shalt.err (!%p1454_p7)
}
  0x1f   : > { %s1458_s11 = scalar_lea.vmem %s1715_s25, 1024  ;;  %p1466_p2 = scmp.lt.s32.totalorder %s1715_s25, %s1715_s25 }
  0x20   : > { %p1459_p9 = scmp.ne.s32.totalorder %s1715_s25, %s1458_s11  ;;  %p1467_p6 = scmp.lt.s32.totalorder %s1458_s11, %s1458_s11 }
  0x22   : > { %p1461_p10 = pnand %p1459_p9, %p1447_p13  ;;  %p1468_p4 = por %p1467_p6, %p1466_p2 }
  0x24   : > { %p1462_p1 = pneg %p1461_p10 }
  0x26   : > { %p1469_p8 = pnand %p1468_p4, %p1462_p1 }
  0x28   : > { %1472 = shalt.err (!%p1469_p8)
}
  0x29   : > { %s1636_s12 = smov 64   ;;  %s1637_s13 = smov 4  }
  0x2a   : > { %1365 = dma.hbm_to_vmem [thread:$0]  (!%p1722_p11), %s2085_s1, 1024, %s1715_s25, [#allocation6], %s1636_s12, %s1636_s12, %s1637_s13  }
  0x2b   : > { %p30_p1 = scmp.eq.s32.totalorder %s29_s29, 0  ;;  %p39_p2 = scmp.ne.s32.totalorder %s1629_s17, %s1625_s16 }
  0x2c   : > { %p40_p4 = scmp.eq.s32.totalorder %s1633_s18, 0  ;;  %p1381_p6 = scmp.lt.s32.totalorder %s1633_s18, 2 }
  0x2d   : > { %s1761_s30 = scalar_select %p30_p1, %s1629_s17, %s32_s28  }
  0x2e   : > { %p41_p8 = por %p40_p4, %p39_p2  ;;  %p2096_p10 = scmp.eq.s32.totalorder %s1690_s19, 1 }
  0x2f   : > { %s181_s26 = sand.u32 1, %s1629_s17   ;;  %s1133_s6 = sshll.u32 %s1633_s18, 11 }
  0x30   : > { %p1765_p12 = por %p2096_p10, %p39_p2  ;;  %s1059_s7 = sshll.u32 %s181_s26, 7 }
  0x31   : > { %s1774_s10 = scalar_lea.hbm %s2084_s0, %s1133_s6  ;;  %s185_s25 = scalar_lea.vmem [#allocation2], %s1059_s7 }
  0x32   : > { %s192_s28 = sshll.u32 %s185_s25, 4  ;;  %p1776_p11 = pnand %p1381_p6, %p41_p8  ;;  %s1780_s28 = int_to_ptr.vmem [resolvable:$true] %s192_s28 }
  0x33   : > { %s1782_s11 = scalar_lea.sflag [#allocation3], %s181_s26  ;;  %s1473_s14 = scalar_lea.hbm %s1774_s10, 2048 }
  0x34   : > { %p1474_p13 = scmp.ne.s32.totalorder %s1774_s10, %s1473_s14  ;;  %p1475_p0 = pneg %p1776_p11 }
  0x35   : > { %s1478_s7 = scalar_lea.hbm %s2084_s0, 4096  ;;  %p1479_p7 = scmp.lt.u32.totalorder %s1774_s10, %s2084_s0 }
  0x36   : > { %p1476_p3 = pnand %p1475_p0, %p1474_p13  ;;  %p1480_p9 = scmp.lt.u32.totalorder %s1478_s7, %s1473_s14 }
  0x37   : > { %p1482_p2 = scmp.lt.u32.totalorder %s1473_s14, %s1774_s10 }
  0x38   : > { %p1477_p5 = pneg %p1476_p3  ;;  %p1481_p1 = por %p1480_p9, %p1479_p7 }
  0x3a   : > { %p1483_p4 = por %p1482_p2, %p1481_p1 }
  0x3c   : > { %p1484_p6 = pnand %p1483_p4, %p1477_p5 }
  0x3e   : > { %1487 = shalt.err (!%p1484_p6)
}
  0x3f   : > { %s1488_s26 = scalar_lea.vmem %s1780_s28, 2048  ;;  %s1638_s25 = smov [#allocation2]  }
  0x40   : > { %p1489_p8 = scmp.ne.s32.totalorder %s1780_s28, %s1488_s26  ;;  %s1493_s24 = sshll.u32 %s1638_s25, 4  ;;  %s1494_s24 = int_to_ptr.vmem [resolvable:$false] %s1493_s24 }
  0x41   : > { %s1495_s6 = scalar_lea.vmem %s1494_s24, 4096  ;;  %p1496_p3 = scmp.lt.s32.totalorder %s1780_s28, %s1494_s24 }
  0x42   : > { %p1491_p10 = pnand %p1489_p8, %p1475_p0  ;;  %p1497_p7 = scmp.lt.s32.totalorder %s1495_s6, %s1488_s26 }
  0x44   : > { %p1492_p13 = pneg %p1491_p10  ;;  %p1498_p9 = por %p1497_p7, %p1496_p3 }
  0x46   : > { %p1499_p1 = pnand %p1498_p9, %p1492_p13 }
  0x48   : > { %1502 = shalt.err (!%p1499_p1)
}
  0x49   : > { %1369 = dma.hbm_to_vmem [thread:$0]  (!%p1776_p11), %s1774_s10, 2048, %s1780_s28, %s1782_s11, %s1636_s12, %s1636_s12, %s1637_s13  }
  0x4a   : > { %p2099_p0 = scmp.ne.s32.totalorder %s2094_s23, 0 }
  0x4b   : > { %s1816_s14 = sand.u32 (!%p2099_p0), 1, %s1625_s16   ;;  %p2100_p5 = scmp.ne.s32.totalorder (!%p2099_p0), %s2092_s21, 0 }
  0x4c   : > { %204 = sbr.rel (%p2099_p0) target bundleno = 444 (0x1bc), region = 28  ;;  %s1063_s7 = sshll.u32 (!%p2099_p0), %s1816_s14, 7 }
  0x4d   : > { %s207_s8 = scalar_lea.sflag (!%p2099_p0), [#allocation3], %s1816_s14  ;;  %s1822_s29 = scalar_lea.vmem (!%p2099_p0), [#allocation2], %s1063_s7 }
  0x53   : > { %1604 = dma.done.wait (%p2100_p5), %s207_s8, 2048  }
  0x54   : > { %1606 = vsyncadd (%p2100_p5), %s207_s8, 4294965248  ;;  %p2101_p11 = scmp.eq.s32.totalorder %s1690_s19, 0 }
  0x56   : > { %1608 = dma.done.wait (%p2101_p11), [#allocation6], 1024   ;;  %p2102_p2 = pmov %p2101_p11 }
  0x57   : > { %v1421_v0 = vld [vmem:[#allocation5] sm:$0xff]   ;;  %v1422_v1 = vld [vmem:[#allocation5 + $0x8] sm:$0xff]   ;;  %v1423_v2 = vld [vmem:[#allocation5 + $0x10] sm:$0xff]   ;;  %s1862_s21 = scalar_lea.vmem [#allocation7], %s1063_s7  ;;  %s1166_s23 = sshll.u32 %s1690_s19, 11 }
  0x58   : > { %1610 = vsyncadd (%p2102_p2), [#allocation6], 4294966272  ;;  %1286 = vmatprep.subr.bf16.mxu0 %v1421_v0  ;;  %1334 = vmatprep.subr.bf16.mxu1 %v1421_v0  ;;  %v1424_v3 = vld [vmem:[#allocation5 + $0x18] sm:$0xff]   ;;  %v1429_v4 = vld [vmem:[%s1822_s29] sm:$0xff]   ;;  %s885_s12 = sshll.u32 %s1862_s21, 4  ;;  %s1915_s28 = scalar_lea.hbm %s2086_s2, %s1166_s23  ;;  %s1917_s12 = int_to_ptr.vmem [resolvable:$true] %s885_s12 }
  0x59   : > { %1287 = vmatpush3.bf16.msra.mxu0 %v1421_v0  ;;  %1342 = vmatpush3.bf16.msra.mxu1 %v1421_v0  ;;  %v1425_v5 = vld [vmem:[#allocation5 + $0x20] sm:$0xff]   ;;  %v1426_v6 = vld [vmem:[#allocation5 + $0x28] sm:$0xff]   ;;  %v1427_v8 = vld [vmem:[#allocation5 + $0x30] sm:$0xff]   ;;  %s862_s11 = scalar_lea.sflag [#allocation4], %s1816_s14  ;;  %s1503_s9 = scalar_lea.vmem %s1917_s12, 2048 }
  0x5a   : > { %1288 = vmatprep.subr.bf16.mxu0 %v1422_v1  ;;  %1335 = vmatprep.subr.bf16.mxu1 %v1422_v1  ;;  %v1437_v7 = vld [vmem:[%s1822_s29 + $0x40] sm:$0xff]   ;;  %v1428_v9 = vld [vmem:[#allocation5 + $0x38] sm:$0xff]   ;;  %v1430_v10 = vld [vmem:[%s1822_s29 + $0x8] sm:$0xff]   ;;  %p1504_p4 = scmp.ne.s32.totalorder %s1917_s12, %s1503_s9  ;;  %s1639_s26 = smov [#allocation7]  }
  0x5b   : > { %1302 = vmatprep.mubr.bf16.mxu0 %v1429_v4  ;;  %1318 = vmatprep.mubr.bf16.mxu1 %v1437_v7  ;;  %v1438_v11 = vld [vmem:[%s1822_s29 + $0x48] sm:$0xff]   ;;  %v1431_v12 = vld [vmem:[%s1822_s29 + $0x10] sm:$0xff]   ;;  %v1432_v14 = vld [vmem:[%s1822_s29 + $0x18] sm:$0xff]   ;;  %s1507_s25 = sshll.u32 %s1639_s26, 4  ;;  %s1508_s25 = int_to_ptr.vmem [resolvable:$false] %s1507_s25 }
  0x5c   : > { %v1439_v13 = vld [vmem:[%s1822_s29 + $0x50] sm:$0xff]   ;;  %v1440_v15 = vld [vmem:[%s1822_s29 + $0x58] sm:$0xff]   ;;  %v1433_v16 = vld [vmem:[%s1822_s29 + $0x20] sm:$0xff]   ;;  %p1505_p6 = pnand %p1504_p4, %p1765_p12  ;;  %s1509_s24 = scalar_lea.vmem %s1508_s25, 4096 }
  0x5d   : > { %1289 = vmatpush3.bf16.msra.mxu0 %v1422_v1  ;;  %1343 = vmatpush3.bf16.msra.mxu1 %v1422_v1  ;;  %v1441_v17 = vld [vmem:[%s1822_s29 + $0x60] sm:$0xff]   ;;  %v1434_v18 = vld [vmem:[%s1822_s29 + $0x28] sm:$0xff]   ;;  %v1435_v20 = vld [vmem:[%s1822_s29 + $0x30] sm:$0xff]   ;;  %p1510_p10 = scmp.lt.s32.totalorder %s1917_s12, %s1508_s25  ;;  %p1511_p13 = scmp.lt.s32.totalorder %s1509_s24, %s1503_s9 }
  0x5e   : > { %1290 = vmatprep.subr.bf16.mxu0 %v1423_v2  ;;  %1336 = vmatprep.subr.bf16.mxu1 %v1423_v2  ;;  %v1442_v19 = vld [vmem:[%s1822_s29 + $0x68] sm:$0xff]   ;;  %v1443_v21 = vld [vmem:[%s1822_s29 + $0x70] sm:$0xff]   ;;  %v1436_v22 = vld [vmem:[%s1822_s29 + $0x38] sm:$0xff]   ;;  %p1506_p8 = pneg %p1505_p6 }
  0x5f   : > { %v1444_v23 = vld [vmem:[%s1822_s29 + $0x78] sm:$0xff]   ;;  %p1512_p3 = por %p1511_p13, %p1510_p10 }
  0x61   : > { %1291 = vmatpush3.bf16.msra.mxu0 %v1423_v2  ;;  %1344 = vmatpush3.bf16.msra.mxu1 %v1423_v2  ;;  %p1513_p7 = pnand %p1512_p3, %p1506_p8 }
  0x62   : > { %1292 = vmatprep.subr.bf16.mxu0 %v1424_v3  ;;  %1337 = vmatprep.subr.bf16.mxu1 %v1424_v3 }
  0x65   : > { %1293 = vmatpush3.bf16.msra.mxu0 %v1424_v3  ;;  %1345 = vmatpush3.bf16.msra.mxu1 %v1424_v3 }
  0x66   : > { %1294 = vmatprep.subr.bf16.mxu0 %v1425_v5  ;;  %1338 = vmatprep.subr.bf16.mxu1 %v1425_v5 }
  0x69   : > { %1295 = vmatpush3.bf16.msra.mxu0 %v1425_v5  ;;  %1346 = vmatpush3.bf16.msra.mxu1 %v1425_v5 }
  0x6a   : > { %1296 = vmatprep.subr.bf16.mxu0 %v1426_v6  ;;  %1339 = vmatprep.subr.bf16.mxu1 %v1426_v6 }
  0x6d   : > { %1297 = vmatpush3.bf16.msra.mxu0 %v1426_v6  ;;  %1347 = vmatpush3.bf16.msra.mxu1 %v1426_v6 }
  0x6e   : > { %1298 = vmatprep.subr.bf16.mxu0 %v1427_v8  ;;  %1340 = vmatprep.subr.bf16.mxu1 %v1427_v8 }
  0x71   : > { %1299 = vmatpush3.bf16.msra.mxu0 %v1427_v8  ;;  %1348 = vmatpush3.bf16.msra.mxu1 %v1427_v8 }
  0x72   : > { %1300 = vmatprep.subr.bf16.mxu0 %v1428_v9  ;;  %1341 = vmatprep.subr.bf16.mxu1 %v1428_v9 }
  0x75   : > { %1301 = vmatpush3.bf16.msra.mxu0 %v1428_v9  ;;  %1349 = vmatpush3.bf16.msra.mxu1 %v1428_v9 }
  0x78   : > { %1303 = vmatmul.mubr.bf16.vlgmr.msra.gmra.mrb[0].mxu0 %v1430_v10  ;;  %1319 = vmatmul.mubr.bf16.vlgmr.msra.gmra.mrb[0].mxu1 %v1438_v11 }
  0x79   : > { %1306 = vmatprep.mubr.bf16.mxu0 %v1431_v12  ;;  %1322 = vmatprep.mubr.bf16.mxu1 %v1439_v13 }
  0x80   : > { %1307 = vmatmul.mubr.bf16.gmra.mrb[4].mxu0 %v1432_v14  ;;  %1323 = vmatmul.mubr.bf16.gmra.mrb[4].mxu1 %v1440_v15 }
  0x81   : > { %1310 = vmatprep.mubr.bf16.mxu0 %v1433_v16  ;;  %1326 = vmatprep.mubr.bf16.mxu1 %v1441_v17 }
  0x88   : > { %1311 = vmatmul.mubr.bf16.gmra.mrb[8].mxu0 %v1434_v18  ;;  %1327 = vmatmul.mubr.bf16.gmra.mrb[8].mxu1 %v1442_v19 }
  0x89   : > { %1314 = vmatprep.mubr.bf16.mxu0 %v1435_v20  ;;  %1330 = vmatprep.mubr.bf16.mxu1 %v1443_v21 }
  0x90   : > { %1315 = vmatmul.mubr.bf16.gmra.mrb[12].mxu0 %v1436_v22  ;;  %1331 = vmatmul.mubr.bf16.gmra.mrb[12].mxu1 %v1444_v23 }
 0x14b   : > { %v1304_v24 = vpop.f32.mrb[0].mxu0  ;;  %v1848_v25 = vpop.f32.mrb[0].mxu1 }
 0x14c   : > { %v478_v26 = vpop.f32.mrb[1].mxu0  ;;  %v1850_v27 = vpop.f32.mrb[1].mxu1  ;;  %v798_v39 = vmul.f32 %v1304_v24, %v1304_v24 }
 0x14d   : > { %v1305_v28 = vpop.f32.mrb[2].mxu0  ;;  %v1852_v29 = vpop.f32.mrb[2].mxu1  ;;  %v796_v30 = vmul.f32 %v478_v26, %v478_v26 }
 0x14e   : > { %v1175_v31 = vpack.c.bf16 %v1305_v28, %v1304_v24  ;;  %v481_v32 = vpop.f32.mrb[3].mxu0  ;;  %v1215_v33 = vpack.c.bf16 %v1852_v29, %v1848_v25  ;;  %v1856_v34 = vpop.f32.mrb[3].mxu1  ;;  %v799_v42 = vmul.f32 %v1305_v28, %v1305_v28 }
 0x14f   : > { %v1170_v35 = vpack.c.bf16 %v481_v32, %v478_v26  ;;  %v765_v36 = vadd.f32 %v481_v32, %v478_v26  ;;  %v797_v37 = vmul.f32 %v481_v32, %v481_v32  ;;  %v1210_v38 = vpack.c.bf16 %v1856_v34, %v1850_v27 }
 0x150   : > { %1247 = vst [vmem:[%s1862_s21 + $0x8] sm:$0xff] %v1175_v31   ;;  %1255 = vst [vmem:[%s1862_s21 + $0x48] sm:$0xff] %v1215_v33  }
 0x151   : > { %1171 = vst [vmem:[%s1862_s21] sm:$0xff] %v1170_v35   ;;  %v766_v40 = vadd.f32 %v1304_v24, %v765_v36  ;;  %v828_v41 = vadd.f32 %v797_v37, %v796_v30  ;;  %1254 = vst [vmem:[%s1862_s21 + $0x40] sm:$0xff] %v1210_v38  }
 0x153   : > { %v829_v43 = vadd.f32 %v828_v41, %v798_v39  ;;  %v1308_v44 = vpop.f32.mrb[4].mxu0  ;;  %v767_v45 = vadd.f32 %v1305_v28, %v766_v40  ;;  %v1868_v46 = vpop.f32.mrb[4].mxu1 }
 0x154   : > { %v494_v47 = vpop.f32.mrb[5].mxu0  ;;  %v1870_v48 = vpop.f32.mrb[5].mxu1  ;;  %v802_v63 = vmul.f32 %v1308_v44, %v1308_v44 }
 0x155   : > { %v768_v49 = vadd.f32 %v767_v45, %v494_v47  ;;  %v800_v50 = vmul.f32 %v494_v47, %v494_v47  ;;  %v830_v51 = vadd.f32 %v829_v43, %v799_v42  ;;  %v1309_v52 = vpop.f32.mrb[6].mxu0  ;;  %v1872_v53 = vpop.f32.mrb[6].mxu1 }
 0x156   : > { %v1185_v54 = vpack.c.bf16 %v1309_v52, %v1308_v44  ;;  %v497_v55 = vpop.f32.mrb[7].mxu0  ;;  %v1225_v56 = vpack.c.bf16 %v1872_v53, %v1868_v46  ;;  %v1876_v57 = vpop.f32.mrb[7].mxu1  ;;  %v803_v2 = vmul.f32 %v1309_v52, %v1309_v52 }
 0x157   : > { %v831_v58 = vadd.f32 %v830_v51, %v800_v50  ;;  %v1180_v59 = vpack.c.bf16 %v497_v55, %v494_v47  ;;  %v769_v60 = vadd.f32 %v768_v49, %v497_v55  ;;  %v801_v61 = vmul.f32 %v497_v55, %v497_v55 }
 0x158   : > { %1249 = vst [vmem:[%s1862_s21 + $0x18] sm:$0xff] %v1185_v54   ;;  %1257 = vst [vmem:[%s1862_s21 + $0x58] sm:$0xff] %v1225_v56   ;;  %v1220_v62 = vpack.c.bf16 %v1876_v57, %v1870_v48 }
 0x159   : > { %1248 = vst [vmem:[%s1862_s21 + $0x10] sm:$0xff] %v1180_v59   ;;  %v770_v0 = vadd.f32 %v1308_v44, %v769_v60  ;;  %v832_v1 = vadd.f32 %v831_v58, %v801_v61  ;;  %v812_v61 = vmul.f32 %v1850_v27, %v1850_v27 }
 0x15a   : > { %1256 = vst [vmem:[%s1862_s21 + $0x50] sm:$0xff] %v1220_v62  }
 0x15b   : > { %v833_v3 = vadd.f32 %v832_v1, %v802_v63  ;;  %v1312_v4 = vpop.f32.mrb[8].mxu0  ;;  %v771_v5 = vadd.f32 %v1309_v52, %v770_v0  ;;  %v1884_v6 = vpop.f32.mrb[8].mxu1 }
 0x15c   : > { %v510_v7 = vpop.f32.mrb[9].mxu0  ;;  %v1886_v8 = vpop.f32.mrb[9].mxu1  ;;  %v806_v23 = vmul.f32 %v1312_v4, %v1312_v4 }
 0x15d   : > { %v772_v9 = vadd.f32 %v771_v5, %v510_v7  ;;  %v804_v10 = vmul.f32 %v510_v7, %v510_v7  ;;  %v834_v11 = vadd.f32 %v833_v3, %v803_v2  ;;  %v1313_v12 = vpop.f32.mrb[10].mxu0  ;;  %v1888_v13 = vpop.f32.mrb[10].mxu1 }
 0x15e   : > { %v1195_v14 = vpack.c.bf16 %v1313_v12, %v1312_v4  ;;  %v513_v15 = vpop.f32.mrb[11].mxu0  ;;  %v1235_v16 = vpack.c.bf16 %v1888_v13, %v1884_v6  ;;  %v1892_v17 = vpop.f32.mrb[11].mxu1  ;;  %v807_v28 = vmul.f32 %v1313_v12, %v1313_v12 }
 0x15f   : > { %v835_v18 = vadd.f32 %v834_v11, %v804_v10  ;;  %v1190_v19 = vpack.c.bf16 %v513_v15, %v510_v7  ;;  %v773_v20 = vadd.f32 %v772_v9, %v513_v15  ;;  %v805_v21 = vmul.f32 %v513_v15, %v513_v15 }
 0x160   : > { %1251 = vst [vmem:[%s1862_s21 + $0x28] sm:$0xff] %v1195_v14   ;;  %1259 = vst [vmem:[%s1862_s21 + $0x68] sm:$0xff] %v1235_v16   ;;  %v1230_v22 = vpack.c.bf16 %v1892_v17, %v1886_v8 }
 0x161   : > { %1250 = vst [vmem:[%s1862_s21 + $0x20] sm:$0xff] %v1190_v19   ;;  %v774_v24 = vadd.f32 %v1312_v4, %v773_v20  ;;  %v836_v26 = vadd.f32 %v835_v18, %v805_v21 }
 0x162   : > { %1258 = vst [vmem:[%s1862_s21 + $0x60] sm:$0xff] %v1230_v22  }
 0x163   : > { %v837_v30 = vadd.f32 %v836_v26, %v806_v23  ;;  %v1316_v31 = vpop.f32.mrb[12].mxu0  ;;  %v775_v32 = vadd.f32 %v1313_v12, %v774_v24  ;;  %v1900_v33 = vpop.f32.mrb[12].mxu1 }
 0x164   : > { %v526_v35 = vpop.f32.mrb[13].mxu0  ;;  %v1902_v36 = vpop.f32.mrb[13].mxu1  ;;  %v810_v54 = vmul.f32 %v1316_v31, %v1316_v31 }
 0x165   : > { %v776_v37 = vadd.f32 %v775_v32, %v526_v35  ;;  %v808_v38 = vmul.f32 %v526_v35, %v526_v35  ;;  %v838_v39 = vadd.f32 %v837_v30, %v807_v28  ;;  %v1317_v40 = vpop.f32.mrb[14].mxu0  ;;  %v1906_v41 = vpop.f32.mrb[14].mxu1 }
 0x166   : > { %v1205_v42 = vpack.c.bf16 %v1317_v40, %v1316_v31  ;;  %v529_v43 = vpop.f32.mrb[15].mxu0  ;;  %v1245_v44 = vpack.c.bf16 %v1906_v41, %v1900_v33  ;;  %v1910_v45 = vpop.f32.mrb[15].mxu1  ;;  %v811_v58 = vmul.f32 %v1317_v40, %v1317_v40 }
 0x167   : > { %v839_v47 = vadd.f32 %v838_v39, %v808_v38  ;;  %v1200_v49 = vpack.c.bf16 %v529_v43, %v526_v35  ;;  %v777_v50 = vadd.f32 %v776_v37, %v529_v43  ;;  %v809_v51 = vmul.f32 %v529_v43, %v529_v43 }
 0x168   : > { %1253 = vst [vmem:[%s1862_s21 + $0x38] sm:$0xff] %v1205_v42   ;;  %1261 = vst [vmem:[%s1862_s21 + $0x78] sm:$0xff] %v1245_v44   ;;  %v1240_v52 = vpack.c.bf16 %v1910_v45, %v1902_v36 }
 0x169   : > { %1252 = vst [vmem:[%s1862_s21 + $0x30] sm:$0xff] %v1200_v49   ;;  %v778_v55 = vadd.f32 %v1316_v31, %v777_v50  ;;  %v840_v56 = vadd.f32 %v839_v47, %v809_v51 }
 0x16a   : > { %1260 = vst [vmem:[%s1862_s21 + $0x70] sm:$0xff] %v1240_v52  }
 0x16b   : > { %v841_v59 = vadd.f32 %v840_v56, %v810_v54  ;;  %v779_v60 = vadd.f32 %v1317_v40, %v778_v55 }
 0x16c   : > { %1516 = shalt.err (!%p1513_p7)
}
 0x16d   : > { %s1517_s6 = scalar_lea.hbm %s1915_s28, 2048  ;;  %s1521_s29 = scalar_lea.hbm %s2086_s2, 4096 }
 0x16e   : > { %p1518_p9 = scmp.ne.s32.totalorder %s1915_s28, %s1517_s6  ;;  %p1522_p5 = scmp.lt.u32.totalorder %s1915_s28, %s2086_s2 }
 0x16f   : > { %p1523_p11 = scmp.lt.u32.totalorder %s1521_s29, %s1517_s6  ;;  %p1525_p4 = scmp.lt.u32.totalorder %s1517_s6, %s1915_s28 }
 0x170   : > { %p1519_p1 = pnand %p1518_p9, %p1765_p12 }
 0x171   : > { %p1524_p2 = por %p1523_p11, %p1522_p5 }
 0x172   : > { %p1520_p0 = pneg %p1519_p1 }
 0x173   : > { %p1526_p6 = por %p1525_p4, %p1524_p2 }
 0x175   : > { %p1527_p8 = pnand %p1526_p6, %p1520_p0 }
 0x177   : > { %1530 = shalt.err (!%p1527_p8)
}
 0x178   : > { %s1640_s13 = smov 64   ;;  %s1641_s10 = smov 4   ;;  %v780_v62 = vadd.f32 %v779_v60, %v1850_v27  ;;  %v842_v63 = vadd.f32 %v841_v59, %v811_v58  ;;  %v813_v2 = vmul.f32 %v1856_v34, %v1856_v34  ;;  %v814_v3 = vmul.f32 %v1848_v25, %v1848_v25 }
 0x179   : > { %1356 = dma.vmem_to_hbm [thread:$0]  (%p1765_p12), %s1917_s12, 2048, %s1915_s28, %s862_s11, %s1640_s13, %s1640_s13, %s1641_s10   ;;  %v815_v7 = vmul.f32 %v1852_v29, %v1852_v29  ;;  %v816_v27 = vmul.f32 %v1870_v48, %v1870_v48  ;;  %v817_v15 = vmul.f32 %v1876_v57, %v1876_v57  ;;  %v820_v20 = vmul.f32 %v1886_v8, %v1886_v8 }
 0x17a   : > { %v843_v0 = vadd.f32 %v842_v63, %v812_v61  ;;  %v781_v1 = vadd.f32 %v780_v62, %v1856_v34  ;;  %v822_v24 = vmul.f32 %v1884_v6, %v1884_v6  ;;  %s1066_s12 = sshll.u32 %s1816_s14, 3  ;;  %v823_v28 = vmul.f32 %v1888_v13, %v1888_v13  ;;  %s866_s28 = sand.u32 1, %s1690_s19  }
 0x17b   : > { %v824_v31 = vmul.f32 %v1902_v36, %v1902_v36  ;;  %s1129_s14 = sshll.u32 %s1690_s19, 7  ;;  %s241_s11 = scalar_lea.vmem [#allocation8], %s1066_s12  ;;  %v826_v38 = vmul.f32 %v1900_v33, %v1900_v33 }
 0x17c   : > { %v782_v4 = vadd.f32 %v1848_v25, %v781_v1  ;;  %v844_v5 = vadd.f32 %v843_v0, %v813_v2  ;;  %v818_v25 = vmul.f32 %v1868_v46, %v1868_v46  ;;  %s901_s9 = sshll.u32 %s241_s11, 4  ;;  %s1997_s26 = scalar_lea.vmem [#allocation10], %s1066_s12  ;;  %s2008_s9 = int_to_ptr.vmem [resolvable:$true] %s901_s9 }
 0x17d   : > { %s914_s25 = sshll.u32 %s1997_s26, 4  ;;  %s2006_s6 = scalar_lea.hbm %s2087_s3, %s1129_s14  ;;  %s2015_s25 = int_to_ptr.vmem [resolvable:$true] %s914_s25 }
 0x17e   : > { %v845_v9 = vadd.f32 %v844_v5, %v814_v3  ;;  %v783_v10 = vadd.f32 %v1852_v29, %v782_v4  ;;  %v819_v29 = vmul.f32 %v1872_v53, %v1872_v53  ;;  %s2013_s29 = scalar_lea.hbm %s2088_s4, %s1129_s14  ;;  %s2017_s21 = scalar_lea.sflag [#allocation9], %s866_s28 }
 0x17f   : > { %s1531_s23 = scalar_lea.vmem %s2008_s9, 128  ;;  %s1642_s13 = smov [#allocation8]  }
 0x180   : > { %v784_v11 = vadd.f32 %v783_v10, %v1870_v48  ;;  %v846_v12 = vadd.f32 %v845_v9, %v815_v7  ;;  %p1532_p10 = scmp.ne.s32.totalorder %s2008_s9, %s1531_s23  ;;  %s1535_s10 = sshll.u32 %s1642_s13, 4  ;;  %s1536_s10 = int_to_ptr.vmem [resolvable:$false] %s1535_s10 }
 0x181   : > { %s1537_s12 = scalar_lea.vmem %s1536_s10, 256  ;;  %p1538_p7 = scmp.lt.s32.totalorder %s2008_s9, %s1536_s10 }
 0x182   : > { %v847_v14 = vadd.f32 %v846_v12, %v816_v27  ;;  %v785_v34 = vadd.f32 %v784_v11, %v1876_v57  ;;  %p1533_p13 = pnand %p1532_p10, %p1765_p12  ;;  %p1539_p9 = scmp.lt.s32.totalorder %s1537_s12, %s1531_s23 }
 0x184   : > { %v786_v16 = vadd.f32 %v1868_v46, %v785_v34  ;;  %v848_v18 = vadd.f32 %v847_v14, %v817_v15  ;;  %v821_v46 = vmul.f32 %v1892_v17, %v1892_v17  ;;  %p1534_p3 = pneg %p1533_p13  ;;  %p1540_p1 = por %p1539_p9, %p1538_p7 }
 0x186   : > { %v849_v19 = vadd.f32 %v848_v18, %v818_v25  ;;  %v787_v48 = vadd.f32 %v1872_v53, %v786_v16  ;;  %p1541_p0 = pnand %p1540_p1, %p1534_p3 }
 0x188   : > { %v788_v21 = vadd.f32 %v787_v48, %v1886_v8  ;;  %v850_v22 = vadd.f32 %v849_v19, %v819_v29 }
 0x18a   : > { %v851_v57 = vadd.f32 %v850_v22, %v820_v20  ;;  %v789_v23 = vadd.f32 %v788_v21, %v1892_v17 }
 0x18c   : > { %v790_v26 = vadd.f32 %v1884_v6, %v789_v23  ;;  %v852_v53 = vadd.f32 %v851_v57, %v821_v46  ;;  %v825_v6 = vmul.f32 %v1910_v45, %v1910_v45 }
 0x18e   : > { %v853_v8 = vadd.f32 %v852_v53, %v822_v24  ;;  %v791_v30 = vadd.f32 %v1888_v13, %v790_v26 }
 0x190   : > { %v792_v32 = vadd.f32 %v791_v30, %v1902_v36  ;;  %v854_v35 = vadd.f32 %v853_v8, %v823_v28  ;;  %v827_v36 = vmul.f32 %v1906_v41, %v1906_v41 }
 0x192   : > { %v855_v17 = vadd.f32 %v854_v35, %v824_v31  ;;  %v793_v37 = vadd.f32 %v792_v32, %v1910_v45 }
 0x194   : > { %v794_v13 = vadd.f32 %v1900_v33, %v793_v37  ;;  %v856_v39 = vadd.f32 %v855_v17, %v825_v6 }
 0x196   : > { %v795_v40 = vadd.f32 %v1906_v41, %v794_v13  ;;  %v857_v42 = vadd.f32 %v856_v39, %v826_v38 }
 0x198   : > { %v858_v33 = vadd.f32 %v857_v42, %v827_v36  ;;  %859 = vst [vmem:[%s241_s11] sm:$0xff] %v795_v40 }
 0x199   : > { %1544 = shalt.err (!%p1541_p0)
}
 0x19a   : > { %s1545_s28 = scalar_lea.hbm %s2006_s6, 128  ;;  %s1549_s19 = scalar_lea.hbm %s2087_s3, 256 }
 0x19b   : > { %p1546_p5 = scmp.ne.s32.totalorder %s2006_s6, %s1545_s28  ;;  %p1550_p4 = scmp.lt.u32.totalorder %s2006_s6, %s2087_s3 }
 0x19c   : > { %p1551_p6 = scmp.lt.u32.totalorder %s1549_s19, %s1545_s28  ;;  %p1553_p10 = scmp.lt.u32.totalorder %s1545_s28, %s2006_s6 }
 0x19d   : > { %p1547_p11 = pnand %p1546_p5, %p1765_p12 }
 0x19e   : > { %p1552_p8 = por %p1551_p6, %p1550_p4 }
 0x19f   : > { %p1548_p2 = pneg %p1547_p11 }
 0x1a0   : > { %p1554_p13 = por %p1553_p10, %p1552_p8 }
 0x1a2   : > { %p1555_p3 = pnand %p1554_p13, %p1548_p2 }
 0x1a4   : > { %1558 = shalt.err (!%p1555_p3)
}
 0x1a5   : > { %1357 = dma.vmem_to_hbm [thread:$0]  (%p1765_p12), %s2008_s9, 128, %s2006_s6, %s2017_s21   ;;  %860 = vst [vmem:[%s1997_s26] sm:$0xff] %v858_v33 }
 0x1a6   : > { %s1559_s8 = scalar_lea.vmem %s2015_s25, 128  ;;  %s1643_s23 = smov [#allocation10]  }
 0x1a7   : > { %p1560_p7 = scmp.ne.s32.totalorder %s2015_s25, %s1559_s8  ;;  %s1563_s13 = sshll.u32 %s1643_s23, 4  ;;  %s1564_s13 = int_to_ptr.vmem [resolvable:$false] %s1563_s13 }
 0x1a8   : > { %s1565_s10 = scalar_lea.vmem %s1564_s13, 256  ;;  %p1566_p0 = scmp.lt.s32.totalorder %s2015_s25, %s1564_s13 }
 0x1a9   : > { %p1561_p9 = pnand %p1560_p7, %p1765_p12  ;;  %p1567_p5 = scmp.lt.s32.totalorder %s1565_s10, %s1559_s8 }
 0x1ab   : > { %p1562_p1 = pneg %p1561_p9  ;;  %p1568_p11 = por %p1567_p5, %p1566_p0 }
 0x1ad   : > { %p1569_p2 = pnand %p1568_p11, %p1562_p1 }
 0x1af   : > { %1572 = shalt.err (!%p1569_p2)
}
 0x1b0   : > { %s1573_s9 = scalar_lea.hbm %s2013_s29, 128  ;;  %s1577_s12 = scalar_lea.hbm %s2088_s4, 256 }
 0x1b1   : > { %p1574_p4 = scmp.ne.s32.totalorder %s2013_s29, %s1573_s9  ;;  %p1578_p10 = scmp.lt.u32.totalorder %s2013_s29, %s2088_s4 }
 0x1b2   : > { %p1579_p13 = scmp.lt.u32.totalorder %s1577_s12, %s1573_s9  ;;  %p1581_p7 = scmp.lt.u32.totalorder %s1573_s9, %s2013_s29 }
 0x1b3   : > { %p1575_p6 = pnand %p1574_p4, %p1765_p12 }
 0x1b4   : > { %p1580_p3 = por %p1579_p13, %p1578_p10 }
 0x1b5   : > { %p1576_p8 = pneg %p1575_p6 }
 0x1b6   : > { %p1582_p9 = por %p1581_p7, %p1580_p3 }
 0x1b8   : > { %p1583_p1 = pnand %p1582_p9, %p1576_p8 }
 0x1ba   : > { %1586 = shalt.err (!%p1583_p1)
}
 0x1bb   : > { %1358 = dma.vmem_to_hbm [thread:$0]  (%p1765_p12), %s2015_s25, 128, %s2013_s29, %s2017_s21  }
 0x1bc PF: > { %s926_s11 = sand.u32 1, %s1621_s15   ;;  %p2103_p0 = scmp.ne.s32.totalorder %s2093_s22, 0 }
 0x1bd   : > { %p2104_p5 = scmp.ge.s32.totalorder %s1633_s18, 2  ;;  %s927_s19 = scalar_lea.sflag [#allocation4], %s926_s11 }
 0x1bf   : > { %p1371_p11 = pnand %p2104_p5, %p2103_p0 }
 0x1c1   : > { %1612 = dma.done.wait (!%p1371_p11), %s927_s19, 2048  }
 0x1c2   : > { %1614 = vsyncadd (!%p1371_p11), %s927_s19, 4294965248  ;;  %s935_s24 = sand.u32 1, %s1055_s20  }
 0x1c3   : > { %s936_s7 = scalar_lea.sflag [#allocation9], %s935_s24 }
 0x1c4   : > { %1616 = dma.done.wait (!%p1371_p11), %s936_s7, 256  }
 0x1c5   : > { %1618 = vsyncadd (!%p1371_p11), %s936_s7, 4294967040  ;;  %p22_p12 = scmp.ge.s32.totalorder %s1727_s27, 4   ;;  %s2105_s15 = smov %s1625_s16 }
 0x1c6   : > { %s2106_s16 = smov %s1629_s17  ;;  %s2107_s17 = smov %s1761_s30 }
 0x1c7   : > { %s2108_s18 = smov %s1727_s27  ;;  %24 = sbr.rel (!%p22_p12) target bundleno = 8 (0x8), region = 109 }
 0x1ce   :  { %950 = vsyncpa [#allocation3], 1 }
 0x1cf   :  { %952 = vsyncpa [#allocation3 + $0x1], 1 }
 0x1d0   :  { %953 = vsyncpa [#allocation6], 1 }
 0x1d1   :  { %954 = vsyncpa [#allocation4], 1 }
 0x1d2   :  { %956 = vsyncpa [#allocation4 + $0x1], 1 }
 0x1d3   :  { %957 = vsyncpa [#allocation9], 1 }
 0x1d4   :  { %959 = vsyncpa [#allocation9 + $0x1], 1 }

</bundles_post_ra>
